<compile_context>
chip_gen: v7x
topology: tpu7x:2x2x1
jax: 0.10.0
libtpu: 0.0.40
codegen_flags: <defaults>
</compile_context>

<pallas_src>
import math
import jax
import jax.numpy as jnp
from jax.experimental import pallas as pl
from jax.experimental.pallas import tpu as pltpu


def _round_up(a, b):
    return (a + b - 1) // b * b


def _conv_relu_pool_kernel(w_ref, xe_ref, xo_ref, o_ref):
    # w_ref:  (C_out, C_in*K+1)        flattened conv weights + bias column (resident)
    # xe_ref: (C_in*K+1, lane_tile)    im2col slab, even conv-output positions (+ ones row)
    # xo_ref: (C_in*K+1, lane_tile)    im2col slab, odd  conv-output positions (+ ones row)
    # o_ref:  (C_out, lane_tile)       pooled output tile
    w = w_ref[...]
    acc_e = jnp.dot(w, xe_ref[...], preferred_element_type=jnp.float32)
    acc_o = jnp.dot(w, xo_ref[...], preferred_element_type=jnp.float32)
    pooled = 0.5 * (jnp.maximum(acc_e, 0.0) + jnp.maximum(acc_o, 0.0))
    o_ref[...] = pooled.astype(o_ref.dtype)


def cnn_block_forward(x, w, b, *, pad=5, compute_dtype=jnp.float32,
                      lane_tile=512, vmem_limit_bytes=None):
    """x: (N, C_in, L), w: (C_out, C_in, K), b: (C_out,).

    compute_dtype: bf16 halves slab DMA bytes and feeds the bf16 MXU on every gen
    (accumulation stays f32); keep f32 for tight tolerances (the default tested path).
    lane_tile: output-lane tile (multiple of 128).  512 is safe everywhere; raise to
    2048-4096 on v6e (optionally with vmem_limit_bytes); keep <=1024 on v5e/v7x.
    """
    N, C_in, L = x.shape
    C_out, _, K = w.shape
    L_out = L + 2 * pad - K + 1          # stride=1 -> "same" length for pad=5, K=11
    L_pool = L_out // 2                  # AvgPool1d(2) drops a trailing odd element

    x = x.astype(jnp.float32)
    w = w.astype(jnp.float32)
    b = b.astype(jnp.float32)

    # ---------------- wrapper glue (plain JAX, fused by XLA) ----------------
    # im2col -> one matmul with contraction over C_in*K (+1 for the folded bias).
    x_pad = jnp.pad(x, ((0, 0), (0, 0), (pad, pad)))
    cols = jnp.stack([x_pad[:, :, k:k + L_out] for k in range(K)], axis=2)   # (N,C_in,K,L_out)
    cols = cols.transpose(1, 2, 0, 3).reshape(C_in * K, N, L_out)            # (CK, N, L_out)

    # Even / odd conv-output positions of each pooling pair (truncate trailing odd elem).
    x_even = cols[:, :, 0:2 * L_pool:2].reshape(C_in * K, N * L_pool)
    x_odd = cols[:, :, 1:2 * L_pool:2].reshape(C_in * K, N * L_pool)

    NLP = N * L_pool
    ones_row = jnp.ones((1, NLP), jnp.float32)
    x_even = jnp.concatenate([x_even, ones_row], axis=0)                      # (CK+1, NLP)
    x_odd = jnp.concatenate([x_odd, ones_row], axis=0)

    # Bias folded into the weight matrix as an extra contraction row.
    w_aug = jnp.concatenate([w.reshape(C_out, C_in * K), b.reshape(C_out, 1)], axis=1)

    CKp1 = C_in * K + 1

    # Lane tiling: multiple of 128 for lane-dense stores; pad the lane axis to the grid.
    lane_tile = max(128, _round_up(int(lane_tile), 128))
    lane_tile = min(lane_tile, _round_up(NLP, 128))
    NLP_pad = _round_up(NLP, lane_tile)
    if NLP_pad > NLP:
        zpad = ((0, 0), (0, NLP_pad - NLP))
        x_even = jnp.pad(x_even, zpad)     # padded lanes produce zeros, sliced off below
        x_odd = jnp.pad(x_odd, zpad)
    n_tiles = NLP_pad // lane_tile

    w_aug = w_aug.astype(compute_dtype)
    x_even = x_even.astype(compute_dtype)
    x_odd = x_odd.astype(compute_dtype)

    elem = jnp.dtype(compute_dtype).itemsize
    cost = pl.CostEstimate(
        flops=2 * 2 * C_out * CKp1 * NLP_pad,
        transcendentals=0,
        bytes_accessed=elem * (C_out * CKp1 + 2 * CKp1 * NLP_pad) + 4 * C_out * NLP_pad,
    )

    cp_kwargs = dict(dimension_semantics=("parallel",))
    if vmem_limit_bytes is not None:
        cp_kwargs["vmem_limit_bytes"] = int(vmem_limit_bytes)

    out = pl.pallas_call(
        _conv_relu_pool_kernel,
        out_shape=jax.ShapeDtypeStruct((C_out, NLP_pad), jnp.float32),
        grid=(n_tiles,),
        in_specs=[
            pl.BlockSpec((C_out, CKp1), lambda i: (0, 0)),        # weights: resident
            pl.BlockSpec((CKp1, lane_tile), lambda i: (0, i)),    # even slab tile
            pl.BlockSpec((CKp1, lane_tile), lambda i: (0, i)),    # odd  slab tile
        ],
        out_specs=pl.BlockSpec((C_out, lane_tile), lambda i: (0, i)),
        compiler_params=pltpu.CompilerParams(**cp_kwargs),
        cost_estimate=cost,
    )(w_aug, x_even, x_odd)

    # (C_out, NLP_pad) -> (N, C_out, L_pool)
    return out[:, :NLP].reshape(C_out, N, L_pool).transpose(1, 0, 2)


def _reference_forward(x, w, b, pad=5):
    """Pure-JAX reference matching PyTorch semantics."""
    y = jax.lax.conv_general_dilated(
        x, w, window_strides=(1,), padding=[(pad, pad)],
        dimension_numbers=("NCH", "OIH", "NCH"),
    )
    y = y + b[None, :, None]
    y = jnp.maximum(y, 0.0)
    N, C, Lo = y.shape
    Lp = Lo // 2
    return y[:, :, : 2 * Lp].reshape(N, C, Lp, 2).mean(axis=-1)


if __name__ == "__main__":
    # Small shapes consistent with the module's forward (Conv1d NCL layout).
    N, C_in, C_out, L, K = 2, 4, 8, 16, 11

    key = jax.random.PRNGKey(0)
    kx, kw, kb = jax.random.split(key, 3)

    x = jax.random.normal(kx, (N, C_in, L), dtype=jnp.float32)

    # Deterministic parameter init mimicking PyTorch Conv1d default (uniform +/- 1/sqrt(fan_in)).
    bound = 1.0 / math.sqrt(C_in * K)
    w = jax.random.uniform(kw, (C_out, C_in, K), minval=-bound, maxval=bound,
                           dtype=jnp.float32)
    b = jax.random.uniform(kb, (C_out,), minval=-bound, maxval=bound,
                           dtype=jnp.float32)

    out = cnn_block_forward(x, w, b)
    out = jax.block_until_ready(out)

    ref = _reference_forward(x, w, b)
    assert out.shape == (N, C_out, L // 2), out.shape
    assert jnp.allclose(out, ref, atol=1e-5, rtol=1e-5), "mismatch vs reference"

    print("KERNEL_OK")
</pallas_src>

<mosaic_0001>
module attributes {stable_mosaic.version = 11 : i64} {
  func.func @_conv_relu_pool_kernel(%arg0: i32, %arg1: memref<8x45xf32, #tpu.memory_space<vmem>>, %arg2: memref<45x128xf32, #tpu.memory_space<vmem>>, %arg3: memref<45x128xf32, #tpu.memory_space<vmem>>, %arg4: memref<8x128xf32, #tpu.memory_space<vmem>>) attributes {dimension_semantics = [#tpu.dimension_semantics<parallel>], iteration_bounds = array<i64: 1>, scalar_prefetch = 0 : i64, scratch_operands = 0 : i64, tpu.core_type = #tpu.core_type<tc>, window_params = [{pipeline_mode = #tpu.pipeline_mode<synchronous>, transform_indices = @transform_0, window_bounds = array<i64: 8, 45>}, {transform_indices = @transform_1, window_bounds = array<i64: 45, 128>}, {transform_indices = @transform_2, window_bounds = array<i64: 45, 128>}, {transform_indices = @transform_3, window_bounds = array<i64: 8, 128>}]} {
    %c0 = arith.constant 0 : index
    %c0_0 = arith.constant 0 : index
    %0 = vector.load %arg1[%c0, %c0_0] : memref<8x45xf32, #tpu.memory_space<vmem>>, vector<8x45xf32>
    %c0_1 = arith.constant 0 : index
    %c0_2 = arith.constant 0 : index
    %1 = vector.load %arg2[%c0_1, %c0_2] : memref<45x128xf32, #tpu.memory_space<vmem>>, vector<45x128xf32>
    %cst = arith.constant dense<0.000000e+00> : vector<8x128xf32>
    %2 = tpu.matmul %0, %1, %cst {dimension_numbers = #tpu.dot_dimension_numbers<[1], [0], [0], [1], [0, 0, 1, 1], [], []>} : vector<8x45xf32>, vector<45x128xf32>, vector<8x128xf32> -> vector<8x128xf32>
    %c0_3 = arith.constant 0 : index
    %c0_4 = arith.constant 0 : index
    %3 = vector.load %arg3[%c0_3, %c0_4] : memref<45x128xf32, #tpu.memory_space<vmem>>, vector<45x128xf32>
    %cst_5 = arith.constant dense<0.000000e+00> : vector<8x128xf32>
    %4 = tpu.matmul %0, %3, %cst_5 {dimension_numbers = #tpu.dot_dimension_numbers<[1], [0], [0], [1], [0, 0, 1, 1], [], []>} : vector<8x45xf32>, vector<45x128xf32>, vector<8x128xf32> -> vector<8x128xf32>
    %cst_6 = arith.constant 0.000000e+00 : f32
    %5 = vector.broadcast %cst_6 : f32 to vector<8x128xf32>
    %6 = arith.maximumf %2, %5 : vector<8x128xf32>
    %cst_7 = arith.constant 0.000000e+00 : f32
    %7 = vector.broadcast %cst_7 : f32 to vector<8x128xf32>
    %8 = arith.maximumf %4, %7 : vector<8x128xf32>
    %9 = arith.addf %6, %8 : vector<8x128xf32>
    %cst_8 = arith.constant 5.000000e-01 : f32
    %10 = vector.broadcast %cst_8 : f32 to vector<8x128xf32>
    %11 = arith.mulf %10, %9 : vector<8x128xf32>
    %c0_9 = arith.constant 0 : index
    %c0_10 = arith.constant 0 : index
    %12 = vector.load %arg4[%c0_9, %c0_10] : memref<8x128xf32, #tpu.memory_space<vmem>>, vector<8x128xf32>
    tpu.vector_store %arg4[%c0_9, %c0_10], %11 {strides = array<i32>} : memref<8x128xf32, #tpu.memory_space<vmem>>, vector<8x128xf32>,
    return
  }
  func.func @transform_0(%arg0: i32) -> (i32, i32) {
    %c0_i32 = arith.constant 0 : i32
    %c0_i32_0 = arith.constant 0 : i32
    %c0_i32_1 = arith.constant 0 : i32
    return %c0_i32, %c0_i32_0 : i32, i32
  }
  func.func @transform_1(%arg0: i32) -> (i32, i32) {
    %c0_i32 = arith.constant 0 : i32
    %c0_i32_0 = arith.constant 0 : i32
    return %c0_i32, %arg0 : i32, i32
  }
  func.func @transform_2(%arg0: i32) -> (i32, i32) {
    %c0_i32 = arith.constant 0 : i32
    %c0_i32_0 = arith.constant 0 : i32
    return %c0_i32, %arg0 : i32, i32
  }
  func.func @transform_3(%arg0: i32) -> (i32, i32) {
    %c0_i32 = arith.constant 0 : i32
    %c0_i32_0 = arith.constant 0 : i32
    return %c0_i32, %arg0 : i32, i32
  }
}

</mosaic_0001>

<bundles_post_ra>
// kernel: tpu_custom_call.1
= control target key start
LH: loop header
LB: loop body
LE: loop exit
PB: predicated region body
PF: predicated region fallthrough
CT: control target
= control target key end

     0   :  { %8 = vsyncpa [#allocation3], 0  ;;  %s495_s0 = inlined_call_operand.hbm [shape: f32[8,45], index: 0, kind: input, shape index: {}]   ;;  %s496_s1 = inlined_call_operand.hbm [shape: f32[45,128], index: 1, kind: input, shape index: {}]   ;;  %s497_s2 = inlined_call_operand.hbm [shape: f32[45,128], index: 2, kind: input, shape index: {}]   ;;  %s498_s3 = inlined_call_operand.hbm [shape: f32[8,128], index: 3, kind: output, shape index: {}]  }
   0x1   :  { %9 = vsyncpa [#allocation6], 0 }
   0x2   :  { %10 = vsyncpa [#allocation4], 0  ;;  %s411_s12 = smov [#allocation5]   ;;  %s317_s16 = scalar_lea.hbm %s496_s1, 768 }
   0x3   :  { %s26_s13 = sshll.u32 %s411_s12, 4  ;;  %p318_p0 = scmp.ne.s32.totalorder %s496_s1, %s317_s16  ;;  %s27_s13 = int_to_ptr.vmem [resolvable:$true] %s26_s13 }
   0x4   :  { %p321_p1 = scmp.lt.u32.totalorder %s317_s16, %s496_s1 }
   0x6   :  { %p323_p2 = pnand %p321_p1, %p318_p0 }
   0x8   :  { %326 = shalt.err (!%p323_p2)
}
   0x9   :  { %s327_s21 = scalar_lea.vmem %s27_s13, 768  ;;  %p332_p4 = scmp.lt.s32.totalorder %s27_s13, %s27_s13 }
   0xa   :  { %p328_p3 = scmp.ne.s32.totalorder %s27_s13, %s327_s21  ;;  %p333_p5 = scmp.lt.s32.totalorder %s327_s21, %s327_s21 }
   0xc   :  { %p334_p6 = por %p333_p5, %p332_p4 }
   0xe   :  { %p335_p7 = pnand %p334_p6, %p328_p3 }
  0x10   :  { %338 = shalt.err (!%p335_p7)
}
  0x11   :  { %s412_s22 = smov 128   ;;  %s413_s23 = smov 8  }
  0x12   :  { %32 = dma.hbm_to_vmem [thread:$0]  %s496_s1, 768, %s27_s13, [#allocation6], %s412_s22, %s412_s22, %s413_s23  }
  0x13   :  { %s414_s26 = smov [#allocation2]   ;;  %s415_s28 = smov [#allocation7]  }
  0x14   :  { %s17_s27 = sshll.u32 %s414_s26, 4  ;;  %s38_s29 = sshll.u32 %s415_s28, 4  ;;  %s18_s27 = int_to_ptr.vmem [resolvable:$true] %s17_s27  ;;  %s39_s29 = int_to_ptr.vmem [resolvable:$true] %s38_s29 }
  0x15   :  { %s339_s5 = scalar_lea.hbm %s495_s0, 128 }
  0x16   :  { %p340_p8 = scmp.ne.s32.totalorder %s495_s0, %s339_s5  ;;  %p343_p9 = scmp.lt.u32.totalorder %s339_s5, %s495_s0 }
  0x18   :  { %p345_p10 = pnand %p343_p9, %p340_p8 }
  0x1a   :  { %348 = shalt.err (!%p345_p10)
}
  0x1b   :  { %s349_s1 = scalar_lea.vmem %s18_s27, 128  ;;  %p354_p12 = scmp.lt.s32.totalorder %s18_s27, %s18_s27 }
  0x1c   :  { %p350_p11 = scmp.ne.s32.totalorder %s18_s27, %s349_s1  ;;  %p355_p13 = scmp.lt.s32.totalorder %s349_s1, %s349_s1 }
  0x1e   :  { %p356_p0 = por %p355_p13, %p354_p12 }
  0x20   :  { %p357_p1 = pnand %p356_p0, %p350_p11 }
  0x22   :  { %360 = shalt.err (!%p357_p1)
}
  0x23   :  { %20 = dma.hbm_to_vmem [thread:$0]  %s495_s0, 128, %s18_s27, [#allocation3]  }
  0x24   :  { %s361_s14 = scalar_lea.hbm %s497_s2, 768 }
  0x25   :  { %p362_p2 = scmp.ne.s32.totalorder %s497_s2, %s361_s14  ;;  %p365_p3 = scmp.lt.u32.totalorder %s361_s14, %s497_s2 }
  0x27   :  { %p367_p4 = pnand %p365_p3, %p362_p2 }
  0x29   :  { %370 = shalt.err (!%p367_p4)
}
  0x2a   :  { %s371_s19 = scalar_lea.vmem %s39_s29, 768  ;;  %p376_p6 = scmp.lt.s32.totalorder %s39_s29, %s39_s29 }
  0x2b   :  { %p372_p5 = scmp.ne.s32.totalorder %s39_s29, %s371_s19  ;;  %p377_p7 = scmp.lt.s32.totalorder %s371_s19, %s371_s19 }
  0x2d   :  { %p378_p8 = por %p377_p7, %p376_p6 }
  0x2f   :  { %p379_p9 = pnand %p378_p8, %p372_p5 }
  0x31   :  { %382 = shalt.err (!%p379_p9)
}
  0x32   :  { %44 = dma.hbm_to_vmem [thread:$0]  %s497_s2, 768, %s39_s29, [#allocation6], %s412_s22, %s412_s22, %s413_s23  }
  0x33   :  { %405 = dma.done.wait [#allocation3], 128  }
  0x34   :  { %406 = vsyncadd [#allocation3], 4294967168 }
  0x35   :  { %407 = dma.done.wait [#allocation6], 1536  }
  0x36   :  { %408 = vsyncadd [#allocation6], 4294965760  ;;  %v416_v0 = vmov 0.0|0.0   ;;  %vm417_vm0 = vmmov 0   ;;  %v418_v1 = vmov 0.0   ;;  %v55_v2 = vld [vmem:[#allocation5] sm:$0xff] }
  0x37   :  { %287 = vmatprep.subr.bf16.mxu0 %v416_v0  ;;  %297 = vmatprep.subr.bf16.mxu1 %v416_v0  ;;  %v56_v3 = vld [vmem:[#allocation5 + $0x8] sm:$0xff]  ;;  %v139_v4 = vld [vmem:[#allocation7] sm:$0xff]  ;;  %v140_v6 = vld [vmem:[#allocation7 + $0x8] sm:$0xff]  ;;  %vm65_vm1 = vcmask 1044480   ;;  %vm419_vm2 = vmmov 1   ;;  %vm61_vm4 = vcmask 367616  }
  0x38   :  { %269 = vmatprep.mubr.msk.f32.mxu0 %vm417_vm0, %v418_v1  ;;  %284 = vmatprep.mubr.msk.f32.mxu1 %vm417_vm0, %v418_v1  ;;  %v288_v5 = vpack.c.bf16 %v56_v3, %v55_v2  ;;  %v57_v7 = vld [vmem:[#allocation5 + $0x10] sm:$0xff]  ;;  %v58_v8 = vld [vmem:[#allocation5 + $0x18] sm:$0xff]  ;;  %v298_v9 = vpack.c.bf16 %v140_v6, %v139_v4  ;;  %v141_v10 = vld [vmem:[#allocation7 + $0x10] sm:$0xff]  ;;  %s420_s2 = smov [#allocation8]  }
  0x39   :  { %v142_v11 = vld [vmem:[#allocation7 + $0x18] sm:$0xff]  ;;  %v291_v12 = vpack.c.bf16 %v58_v8, %v57_v7  ;;  %v59_v14 = vld [vmem:[#allocation5 + $0x20] sm:$0xff]  ;;  %v143_v16 = vld [vmem:[#allocation7 + $0x20] sm:$0xff]  ;;  %s229_s21 = sshll.u32 %s420_s2, 4  ;;  %s230_s21 = int_to_ptr.vmem [resolvable:$true] %s229_s21 }
  0x3a   :  { %289 = vmatpush3.bf16.msra.mxu0 %v288_v5  ;;  %299 = vmatpush3.bf16.msra.mxu1 %v298_v9  ;;  %v301_v13 = vpack.c.bf16 %v142_v11, %v141_v10  ;;  %v60_v15 = vld [vmem:[#allocation5 + $0x28] sm:$0x1f]  ;;  %v144_v17 = vld [vmem:[#allocation7 + $0x28] sm:$0x1f]  ;;  %vm295_vm3 = vmpackc.low %vm65_vm1, %vm419_vm2  ;;  %s383_s22 = scalar_lea.vmem %s230_s21, 128  ;;  %p388_p11 = scmp.lt.s32.totalorder %s230_s21, %s230_s21 }
  0x3b   :  { %290 = vmatprep.subr.bf16.mxu0 %v416_v0  ;;  %300 = vmatprep.subr.bf16.mxu1 %v416_v0  ;;  %v294_v18 = vpack.c.bf16 %v60_v15, %v59_v14  ;;  %v304_v19 = vpack.c.bf16 %v144_v17, %v143_v16  ;;  %v54_v20 = vld [vmem:[#allocation2] sm:$0xff]  ;;  %p384_p10 = scmp.ne.s32.totalorder %s230_s21, %s383_s22  ;;  %p389_p12 = scmp.lt.s32.totalorder %s383_s22, %s383_s22 }
  0x3d   :  { %p390_p13 = por %p389_p12, %p388_p11 }
  0x3e   :  { %292 = vmatpush3.bf16.msra.mxu0 %v291_v12  ;;  %302 = vmatpush3.bf16.msra.mxu1 %v301_v13 }
  0x3f   :  { %293 = vmatprep.subr.bf16.mxu0 %v416_v0  ;;  %303 = vmatprep.subr.bf16.mxu1 %v416_v0  ;;  %p391_p0 = pnand %p390_p13, %p384_p10 }
  0x42   :  { %296 = vmatpush3.bf16.msk.msra.mxu0 %vm295_vm3, %v294_v18  ;;  %306 = vmatpush3.bf16.msk.msra.mxu1 %vm295_vm3, %v304_v19 }
  0x45   :  { %270 = vmatmul.mubr.msk.f32.vlgmr.msra.gmra.mrb[0].mxu0 %vm61_vm4, %v54_v20  ;;  %285 = vmatmul.mubr.msk.f32.vlgmr.msra.gmra.mrb[0].mxu1 %vm61_vm4, %v54_v20 }
 0x118   :  { %v135_v21 = vpop.f32.mrb[0].mxu0  ;;  %v214_v23 = vpop.f32.mrb[0].mxu1 }
 0x119   :  { %v218_v22 = vmax.f32 %v135_v21, 0.0  ;;  %v271_v24 = vpop.f32.mrb[1].mxu0  ;;  %v219_v25 = vmax.f32 %v214_v23, 0.0  ;;  %v286_v26 = vpop.f32.mrb[1].mxu1 }
 0x11b   :  { %v220_v27 = vadd.f32 %v219_v25, %v218_v22 }
 0x11d   :  { %v221_v28 = vmul.f32 0.5, %v220_v27 }
 0x11f   :  { %222 = vst [vmem:[#allocation8] sm:$0xff] %v221_v28 }
 0x120   :  { %394 = shalt.err (!%p391_p0)
}
 0x121   :  { %s395_s25 = scalar_lea.hbm %s498_s3, 128 }
 0x122   :  { %p396_p1 = scmp.ne.s32.totalorder %s498_s3, %s395_s25  ;;  %p399_p2 = scmp.lt.u32.totalorder %s395_s25, %s498_s3 }
 0x124   :  { %p401_p3 = pnand %p399_p2, %p396_p1 }
 0x126   :  { %404 = shalt.err (!%p401_p3)
}
 0x127   :  { %232 = dma.vmem_to_hbm [thread:$0]  %s230_s21, 128, %s498_s3, [#allocation4]  }
 0x128   :  { %409 = dma.done.wait [#allocation4], 128  }
 0x129   :  { %410 = vsyncadd [#allocation4], 4294967168 }
 0x12a   :  { %236 = vsyncpa [#allocation3], 1 }
 0x12b   :  { %237 = vsyncpa [#allocation6], 1 }
 0x12c   :  { %238 = vsyncpa [#allocation4], 1 }

</bundles_post_ra>
